<compile_context>
chip_gen: v6e
topology: v6e:2x2x1
jax: 0.10.0
libtpu: 0.0.40
codegen_flags: <defaults>
</compile_context>

<pallas_src>
import functools

import numpy as np
import jax
import jax.numpy as jnp
from jax.experimental import pallas as pl
from jax.experimental.pallas import tpu as pltpu


def _round_up(a: int, b: int) -> int:
    return ((a + b - 1) // b) * b


def _reciprocal(x):
    # pl.reciprocal(approx=True) lowers to the EUP (free slot next to VPU work).
    if hasattr(pl, "reciprocal"):
        return pl.reciprocal(x, approx=True)
    return 1.0 / x


def _compiler_params():
    cls = getattr(pltpu, "CompilerParams", None)
    if cls is None:
        return None
    return cls(dimension_semantics=("parallel",),
               vmem_limit_bytes=32 * 1024 * 1024)


def _attention_constants(dim: int, heads: int):
    """Tiny constant matrices that run the per-token heads x heads attention on
    the MXU in the (features-on-sublanes, tokens-on-lanes) layout.

      r4[i, hd*i + d] = dim**-0.5   (score reduce over head i's hd rows + scale)
      e4[hd*i + d, i] = 1.0         (broadcast attention row i to hd sublanes)
    """
    hd = dim // heads
    scale = float(dim) ** -0.5
    r4 = np.zeros((heads, dim), np.float32)
    e4 = np.zeros((dim, heads), np.float32)
    for i in range(heads):
        r4[i, i * hd:(i + 1) * hd] = scale
        e4[i * hd:(i + 1) * hd, i] = 1.0
    return jnp.asarray(r4), jnp.asarray(e4)


def mha_kernel(x_ref, wqkvT_ref, wout_ref, b_ref, r4_ref, e4_ref, o_ref,
               *, heads, dim):
    """One tile of T tokens.  x_ref: (T, dim) row-major; o_ref: (T, dim)."""
    H = heads
    hd = dim // H

    x = x_ref[...]                                    # (T, dim)
    wqkvT = wqkvT_ref[...]                            # (3*dim, dim)
    if x.dtype != wqkvT.dtype:                        # in-kernel cast (free; no extra
        x = x.astype(wqkvT.dtype)                     # HBM pass in the wrapper)

    # qkv^T = Wqkv^T @ x^T ("NT" matmul: contraction on the lane axis of both
    # operands, so x is consumed as loaded).  Tokens land on the 128-lane axis.
    # TODO(synk): verify in the Mosaic dump that no per-tile relayout of x is
    # inserted here; if it is, flip the operand order / pre-transpose once.
    qkvT = jax.lax.dot_general(
        wqkvT, x, dimension_numbers=(((1,), (1,)), ((), ())),
        preferred_element_type=jnp.float32)           # (3*dim, T) f32

    qT = qkvT[0 * dim:1 * dim]                        # (dim, T)
    kT = qkvT[1 * dim:2 * dim]
    vT = qkvT[2 * dim:3 * dim]
    k_heads = [kT[j * hd:(j + 1) * hd] for j in range(H)]   # hd-row aligned slabs
    v_heads = [vT[j * hd:(j + 1) * hd] for j in range(H)]

    r4 = r4_ref[...]                                  # (H, dim)  scale folded in
    e4 = e4_ref[...]                                  # (dim, H)

    # Scores per key-head j, reduced on the MXU: s_j[i, t] = scale * q_i(t).k_j(t).
    # k_rep_j tiles head j's hd rows across all H query-head slots (aligned
    # vreg copies), so the elementwise product stays lane-dense.
    s_list = []
    for j in range(H):
        k_rep = jnp.concatenate([k_heads[j]] * H, axis=0)            # (dim, T)
        s_list.append(jnp.dot(r4, qT * k_rep,
                              preferred_element_type=jnp.float32))   # (H, T)

    # Softmax over j: grouped max / sum are plain elementwise ops across the H
    # dense (H, T) slabs -- no sublane-sparse (1, T) intermediates, no XLU.
    m = s_list[0]
    for j in range(1, H):
        m = jnp.maximum(m, s_list[j])
    e_list = [jnp.exp(sj - m) for sj in s_list]       # H dense exps total = H*H rows
    denom = e_list[0]
    for j in range(1, H):
        denom = denom + e_list[j]
    rden = _reciprocal(denom)                         # (H, T), EUP

    # out^T[hd*i+d, t] = sum_j attn_j[i, t] * v^T[hd*j+d, t]
    # e4 broadcasts each attention row to hd sublanes on the MXU; v_rep_j tiles
    # head j's values across the H output-head slots (aligned copies).
    outT = None
    for j in range(H):
        a_b = jnp.dot(e4, e_list[j] * rden,
                      preferred_element_type=jnp.float32)            # (dim, T)
        v_rep = jnp.concatenate([v_heads[j]] * H, axis=0)            # (dim, T)
        term = a_b * v_rep
        outT = term if outT is None else outT + term                 # (dim, T) f32

    # Single in-kernel layout flip back to row-major tokens, output projection,
    # bias, cast to the output dtype, and a contiguous (T, dim) store.
    out_t = outT.T.astype(wout_ref.dtype)             # (T, dim)
    y = jnp.dot(out_t, wout_ref[...], preferred_element_type=jnp.float32)
    o_ref[...] = (y + b_ref[...]).astype(o_ref.dtype)


def multi_head_attention(x, w_qkv, w_out, b_out, heads,
                         *, tile_m=2048, compute_dtype=None):
    """Pallas forward matching the PyTorch MultiHeadAttention module.

    x:      (B, N, dim)
    w_qkv:  (dim, 3*dim)   == to_qkv.weight.T  (bias=False)
    w_out:  (dim, dim)     == to_out.weight.T
    b_out:  (dim,) or (1, dim)

    compute_dtype: optional MXU operand dtype (e.g. jnp.bfloat16; safe on
      v5e/v6e/v7x).  Weights are cast once here; x is cast inside the kernel,
      so HBM read bytes only shrink when x is already stored in that dtype.
      The output dtype always matches x.dtype.
    """
    B, N, dim = x.shape
    M = B * N
    assert dim % heads == 0
    cd = jnp.dtype(compute_dtype) if compute_dtype is not None else x.dtype

    x2 = x.reshape(M, dim)                            # free view, no copy

    # One-time weight preprocessing (tiny): transpose Wqkv so the in-kernel
    # matmul is (features, features) @ (features, tokens).  The attention
    # scale is folded into the f32 r4 constant, not into the (possibly bf16)
    # weights, so it is not re-rounded.
    wqkvT = jnp.asarray(w_qkv).T.astype(cd)           # (3*dim, dim)
    wout = jnp.asarray(w_out).astype(cd)              # (dim, dim)
    bias = jnp.asarray(b_out, jnp.float32).reshape(1, dim)
    r4, e4 = _attention_constants(dim, heads)

    # Tile over flattened tokens.  No padding copy: grid = cdiv(M, tile) and
    # the ragged tail relies on Pallas' clipped boundary reads/writes (rows are
    # independent).  Moderate M is split into >= 2 balanced blocks so both v7x
    # TensorCores get work; large M uses tile_m-sized blocks.
    tile_m = max(16, _round_up(tile_m, 16))
    if M <= tile_m:
        tile = _round_up(M, 16) if M < 1024 else _round_up(pl.cdiv(M, 2), 128)
    else:
        tile = min(tile_m, max(128, _round_up(pl.cdiv(M, 2), 128)))
    grid = (pl.cdiv(M, tile),)

    kernel = functools.partial(mha_kernel, heads=heads, dim=dim)
    const = lambda i: (0, 0)

    y = pl.pallas_call(
        kernel,
        out_shape=jax.ShapeDtypeStruct((M, dim), x.dtype),
        grid=grid,
        in_specs=[
            pl.BlockSpec((tile, dim), lambda i: (i, 0)),    # x tile
            pl.BlockSpec((3 * dim, dim), const),            # Wqkv^T (VMEM resident)
            pl.BlockSpec((dim, dim), const),                # Wout   (VMEM resident)
            pl.BlockSpec((1, dim), const),                  # bias   (VMEM resident)
            pl.BlockSpec((heads, dim), const),              # r4     (VMEM resident)
            pl.BlockSpec((dim, heads), const),              # e4     (VMEM resident)
        ],
        out_specs=pl.BlockSpec((tile, dim), lambda i: (i, 0)),   # row-major y tile
        compiler_params=_compiler_params(),
    )(x2, wqkvT, wout, bias, r4, e4)

    return y.reshape(B, N, dim)                       # free view, no copy


def ref_multi_head_attention(x, w_qkv, w_out, b_out, heads):
    """Pure-JAX reference mirroring the PyTorch forward exactly."""
    B, N, dim = x.shape
    hd = dim // heads
    qkv = x @ w_qkv                                   # (B, N, 3*dim)
    q, k, v = jnp.split(qkv, 3, axis=-1)
    q = q.reshape(B, N, heads, hd)
    k = k.reshape(B, N, heads, hd)
    v = v.reshape(B, N, heads, hd)
    dots = jnp.einsum('bhid,bhjd->bhij', q, k) * (dim ** -0.5)
    attn = jax.nn.softmax(dots, axis=-1)
    out = jnp.einsum('bhij,bhjd->bhid', attn, v).reshape(B, N, dim)
    return out @ w_out + jnp.asarray(b_out).reshape(1, dim)


if __name__ == "__main__":
    key = jax.random.PRNGKey(0)
    kx, kq, kw, kb, kx2 = jax.random.split(key, 5)

    B, N, dim, heads = 2, 8, 32, 4
    x = jax.random.normal(kx, (B, N, dim), dtype=jnp.float32)
    w_qkv = jax.random.normal(kq, (dim, 3 * dim), dtype=jnp.float32) * 0.05
    w_out = jax.random.normal(kw, (dim, dim), dtype=jnp.float32) * 0.05
    b_out = jax.random.normal(kb, (1, dim), dtype=jnp.float32) * 0.05

    # 1) Small single-tile run (f32 in, f32 out).
    y = jax.block_until_ready(multi_head_attention(x, w_qkv, w_out, b_out, heads))
    y_ref = ref_multi_head_attention(x, w_qkv, w_out, b_out, heads)
    assert y.shape == (B, N, dim) and y.dtype == x.dtype
    assert jnp.allclose(y, y_ref, rtol=2e-3, atol=2e-3), "f32 mismatch vs reference"

    # 2) Multi-tile run exercising the grid + ragged-tail path (no padding copy).
    B2, N2 = 3, 50                                    # M = 150 -> one 128 block + ragged 22
    x_big = jax.random.normal(kx2, (B2, N2, dim), dtype=jnp.float32)
    y_big = jax.block_until_ready(
        multi_head_attention(x_big, w_qkv, w_out, b_out, heads, tile_m=128))
    y_big_ref = ref_multi_head_attention(x_big, w_qkv, w_out, b_out, heads)
    assert jnp.allclose(y_big, y_big_ref, rtol=2e-3, atol=2e-3), "tiled mismatch vs reference"

    # 3) bf16 MXU operands with f32 x in HBM (weights cast once, x cast in-kernel).
    y_bf16 = jax.block_until_ready(
        multi_head_attention(x, w_qkv, w_out, b_out, heads, compute_dtype=jnp.bfloat16))
    assert jnp.allclose(y_bf16, y_ref, rtol=5e-2, atol=1e-2), "bf16 mismatch vs reference"

    # 4) bf16 x end-to-end (bf16 HBM read, bf16 output writeback; f32 softmax/accum).
    x_bf = x.astype(jnp.bfloat16)
    y_bf_io = jax.block_until_ready(
        multi_head_attention(x_bf, w_qkv, w_out, b_out, heads))
    assert y_bf_io.dtype == jnp.bfloat16
    assert jnp.allclose(y_bf_io.astype(jnp.float32), y_ref, rtol=5e-2, atol=3e-2), \
        "bf16-io mismatch vs reference"

    print("KERNEL_OK")
</pallas_src>

<mosaic_0001>
module attributes {stable_mosaic.version = 11 : i64} {
  func.func @mha_kernel(%arg0: i32, %arg1: memref<16x32xf32, #tpu.memory_space<vmem>>, %arg2: memref<96x32xf32, #tpu.memory_space<vmem>>, %arg3: memref<32x32xf32, #tpu.memory_space<vmem>>, %arg4: memref<1x32xf32, #tpu.memory_space<vmem>>, %arg5: memref<4x32xf32, #tpu.memory_space<vmem>>, %arg6: memref<32x4xf32, #tpu.memory_space<vmem>>, %arg7: memref<16x32xf32, #tpu.memory_space<vmem>>) attributes {dimension_semantics = [#tpu.dimension_semantics<parallel>], iteration_bounds = array<i64: 1>, scalar_prefetch = 0 : i64, scratch_operands = 0 : i64, tpu.core_type = #tpu.core_type<tc>, window_params = [{transform_indices = @transform_0, window_bounds = array<i64: 16, 32>}, {pipeline_mode = #tpu.pipeline_mode<synchronous>, transform_indices = @transform_1, window_bounds = array<i64: 96, 32>}, {pipeline_mode = #tpu.pipeline_mode<synchronous>, transform_indices = @transform_2, window_bounds = array<i64: 32, 32>}, {pipeline_mode = #tpu.pipeline_mode<synchronous>, transform_indices = @transform_3, window_bounds = array<i64: 1, 32>}, {pipeline_mode = #tpu.pipeline_mode<synchronous>, transform_indices = @transform_4, window_bounds = array<i64: 4, 32>}, {pipeline_mode = #tpu.pipeline_mode<synchronous>, transform_indices = @transform_5, window_bounds = array<i64: 32, 4>}, {transform_indices = @transform_6, window_bounds = array<i64: 16, 32>}]} {
    %c0 = arith.constant 0 : index
    %c0_0 = arith.constant 0 : index
    %0 = vector.load %arg1[%c0, %c0_0] : memref<16x32xf32, #tpu.memory_space<vmem>>, vector<16x32xf32>
    %c0_1 = arith.constant 0 : index
    %c0_2 = arith.constant 0 : index
    %1 = vector.load %arg2[%c0_1, %c0_2] : memref<96x32xf32, #tpu.memory_space<vmem>>, vector<96x32xf32>
    %cst = arith.constant dense<0.000000e+00> : vector<96x16xf32>
    %2 = tpu.matmul %1, %0, %cst {dimension_numbers = #tpu.dot_dimension_numbers<[1], [1], [0], [0], [0, 0, 1, 0], [], []>} : vector<96x32xf32>, vector<16x32xf32>, vector<96x16xf32> -> vector<96x16xf32>
    %3 = vector.extract_strided_slice %2 {offsets = [0, 0], sizes = [32, 16], strides = [1, 1]} : vector<96x16xf32> to vector<32x16xf32>
    %4 = vector.extract_strided_slice %2 {offsets = [32, 0], sizes = [32, 16], strides = [1, 1]} : vector<96x16xf32> to vector<32x16xf32>
    %5 = vector.extract_strided_slice %2 {offsets = [64, 0], sizes = [32, 16], strides = [1, 1]} : vector<96x16xf32> to vector<32x16xf32>
    %6 = vector.extract_strided_slice %4 {offsets = [0, 0], sizes = [8, 16], strides = [1, 1]} : vector<32x16xf32> to vector<8x16xf32>
    %7 = vector.extract_strided_slice %4 {offsets = [8, 0], sizes = [8, 16], strides = [1, 1]} : vector<32x16xf32> to vector<8x16xf32>
    %8 = vector.extract_strided_slice %4 {offsets = [16, 0], sizes = [8, 16], strides = [1, 1]} : vector<32x16xf32> to vector<8x16xf32>
    %9 = vector.extract_strided_slice %4 {offsets = [24, 0], sizes = [8, 16], strides = [1, 1]} : vector<32x16xf32> to vector<8x16xf32>
    %10 = vector.extract_strided_slice %5 {offsets = [0, 0], sizes = [8, 16], strides = [1, 1]} : vector<32x16xf32> to vector<8x16xf32>
    %11 = vector.extract_strided_slice %5 {offsets = [8, 0], sizes = [8, 16], strides = [1, 1]} : vector<32x16xf32> to vector<8x16xf32>
    %12 = vector.extract_strided_slice %5 {offsets = [16, 0], sizes = [8, 16], strides = [1, 1]} : vector<32x16xf32> to vector<8x16xf32>
    %13 = vector.extract_strided_slice %5 {offsets = [24, 0], sizes = [8, 16], strides = [1, 1]} : vector<32x16xf32> to vector<8x16xf32>
    %c0_3 = arith.constant 0 : index
    %c0_4 = arith.constant 0 : index
    %14 = vector.load %arg5[%c0_3, %c0_4] : memref<4x32xf32, #tpu.memory_space<vmem>>, vector<4x32xf32>
    %c0_5 = arith.constant 0 : index
    %c0_6 = arith.constant 0 : index
    %15 = vector.load %arg6[%c0_5, %c0_6] : memref<32x4xf32, #tpu.memory_space<vmem>>, vector<32x4xf32>
    %16 = tpu.concatenate %6, %6, %6, %6 in 0 : vector<8x16xf32>, vector<8x16xf32>, vector<8x16xf32>, vector<8x16xf32> -> vector<32x16xf32>
    %17 = arith.mulf %3, %16 : vector<32x16xf32>
    %cst_7 = arith.constant dense<0.000000e+00> : vector<4x16xf32>
    %18 = tpu.matmul %14, %17, %cst_7 {dimension_numbers = #tpu.dot_dimension_numbers<[1], [0], [0], [1], [0, 0, 1, 1], [], []>} : vector<4x32xf32>, vector<32x16xf32>, vector<4x16xf32> -> vector<4x16xf32>
    %19 = tpu.concatenate %7, %7, %7, %7 in 0 : vector<8x16xf32>, vector<8x16xf32>, vector<8x16xf32>, vector<8x16xf32> -> vector<32x16xf32>
    %20 = arith.mulf %3, %19 : vector<32x16xf32>
    %cst_8 = arith.constant dense<0.000000e+00> : vector<4x16xf32>
    %21 = tpu.matmul %14, %20, %cst_8 {dimension_numbers = #tpu.dot_dimension_numbers<[1], [0], [0], [1], [0, 0, 1, 1], [], []>} : vector<4x32xf32>, vector<32x16xf32>, vector<4x16xf32> -> vector<4x16xf32>
    %22 = tpu.concatenate %8, %8, %8, %8 in 0 : vector<8x16xf32>, vector<8x16xf32>, vector<8x16xf32>, vector<8x16xf32> -> vector<32x16xf32>
    %23 = arith.mulf %3, %22 : vector<32x16xf32>
    %cst_9 = arith.constant dense<0.000000e+00> : vector<4x16xf32>
    %24 = tpu.matmul %14, %23, %cst_9 {dimension_numbers = #tpu.dot_dimension_numbers<[1], [0], [0], [1], [0, 0, 1, 1], [], []>} : vector<4x32xf32>, vector<32x16xf32>, vector<4x16xf32> -> vector<4x16xf32>
    %25 = tpu.concatenate %9, %9, %9, %9 in 0 : vector<8x16xf32>, vector<8x16xf32>, vector<8x16xf32>, vector<8x16xf32> -> vector<32x16xf32>
    %26 = arith.mulf %3, %25 : vector<32x16xf32>
    %cst_10 = arith.constant dense<0.000000e+00> : vector<4x16xf32>
    %27 = tpu.matmul %14, %26, %cst_10 {dimension_numbers = #tpu.dot_dimension_numbers<[1], [0], [0], [1], [0, 0, 1, 1], [], []>} : vector<4x32xf32>, vector<32x16xf32>, vector<4x16xf32> -> vector<4x16xf32>
    %28 = arith.maximumf %18, %21 : vector<4x16xf32>
    %29 = arith.maximumf %28, %24 : vector<4x16xf32>
    %30 = arith.maximumf %29, %27 : vector<4x16xf32>
    %31 = arith.subf %18, %30 : vector<4x16xf32>
    %32 = math.exp %31 : vector<4x16xf32>
    %33 = arith.subf %21, %30 : vector<4x16xf32>
    %34 = math.exp %33 : vector<4x16xf32>
    %35 = arith.subf %24, %30 : vector<4x16xf32>
    %36 = math.exp %35 : vector<4x16xf32>
    %37 = arith.subf %27, %30 : vector<4x16xf32>
    %38 = math.exp %37 : vector<4x16xf32>
    %39 = arith.addf %32, %34 : vector<4x16xf32>
    %40 = arith.addf %39, %36 : vector<4x16xf32>
    %41 = arith.addf %40, %38 : vector<4x16xf32>
    %42 = tpu.reciprocal %41 {approx = true} : vector<4x16xf32> -> vector<4x16xf32>
    %43 = arith.mulf %32, %42 : vector<4x16xf32>
    %cst_11 = arith.constant dense<0.000000e+00> : vector<32x16xf32>
    %44 = tpu.matmul %15, %43, %cst_11 {dimension_numbers = #tpu.dot_dimension_numbers<[1], [0], [0], [1], [0, 0, 1, 1], [], []>} : vector<32x4xf32>, vector<4x16xf32>, vector<32x16xf32> -> vector<32x16xf32>
    %45 = tpu.concatenate %10, %10, %10, %10 in 0 : vector<8x16xf32>, vector<8x16xf32>, vector<8x16xf32>, vector<8x16xf32> -> vector<32x16xf32>
    %46 = arith.mulf %44, %45 : vector<32x16xf32>
    %47 = arith.mulf %34, %42 : vector<4x16xf32>
    %cst_12 = arith.constant dense<0.000000e+00> : vector<32x16xf32>
    %48 = tpu.matmul %15, %47, %cst_12 {dimension_numbers = #tpu.dot_dimension_numbers<[1], [0], [0], [1], [0, 0, 1, 1], [], []>} : vector<32x4xf32>, vector<4x16xf32>, vector<32x16xf32> -> vector<32x16xf32>
    %49 = tpu.concatenate %11, %11, %11, %11 in 0 : vector<8x16xf32>, vector<8x16xf32>, vector<8x16xf32>, vector<8x16xf32> -> vector<32x16xf32>
    %50 = arith.mulf %48, %49 : vector<32x16xf32>
    %51 = arith.addf %46, %50 : vector<32x16xf32>
    %52 = arith.mulf %36, %42 : vector<4x16xf32>
    %cst_13 = arith.constant dense<0.000000e+00> : vector<32x16xf32>
    %53 = tpu.matmul %15, %52, %cst_13 {dimension_numbers = #tpu.dot_dimension_numbers<[1], [0], [0], [1], [0, 0, 1, 1], [], []>} : vector<32x4xf32>, vector<4x16xf32>, vector<32x16xf32> -> vector<32x16xf32>
    %54 = tpu.concatenate %12, %12, %12, %12 in 0 : vector<8x16xf32>, vector<8x16xf32>, vector<8x16xf32>, vector<8x16xf32> -> vector<32x16xf32>
    %55 = arith.mulf %53, %54 : vector<32x16xf32>
    %56 = arith.addf %51, %55 : vector<32x16xf32>
    %57 = arith.mulf %38, %42 : vector<4x16xf32>
    %cst_14 = arith.constant dense<0.000000e+00> : vector<32x16xf32>
    %58 = tpu.matmul %15, %57, %cst_14 {dimension_numbers = #tpu.dot_dimension_numbers<[1], [0], [0], [1], [0, 0, 1, 1], [], []>} : vector<32x4xf32>, vector<4x16xf32>, vector<32x16xf32> -> vector<32x16xf32>
    %59 = tpu.concatenate %13, %13, %13, %13 in 0 : vector<8x16xf32>, vector<8x16xf32>, vector<8x16xf32>, vector<8x16xf32> -> vector<32x16xf32>
    %60 = arith.mulf %58, %59 : vector<32x16xf32>
    %61 = arith.addf %56, %60 : vector<32x16xf32>
    %62 = tpu.transpose %61, [1, 0] : vector<32x16xf32> -> vector<16x32xf32>
    %c0_15 = arith.constant 0 : index
    %c0_16 = arith.constant 0 : index
    %63 = vector.load %arg3[%c0_15, %c0_16] : memref<32x32xf32, #tpu.memory_space<vmem>>, vector<32x32xf32>
    %cst_17 = arith.constant dense<0.000000e+00> : vector<16x32xf32>
    %64 = tpu.matmul %62, %63, %cst_17 {dimension_numbers = #tpu.dot_dimension_numbers<[1], [0], [0], [1], [0, 0, 1, 1], [], []>} : vector<16x32xf32>, vector<32x32xf32>, vector<16x32xf32> -> vector<16x32xf32>
    %c0_18 = arith.constant 0 : index
    %c0_19 = arith.constant 0 : index
    %65 = vector.load %arg4[%c0_18, %c0_19] : memref<1x32xf32, #tpu.memory_space<vmem>>, vector<1x32xf32>
    %66 = vector.broadcast %65 : vector<1x32xf32> to vector<16x32xf32>
    %67 = arith.addf %64, %66 : vector<16x32xf32>
    %c0_20 = arith.constant 0 : index
    %c0_21 = arith.constant 0 : index
    %68 = vector.load %arg7[%c0_20, %c0_21] : memref<16x32xf32, #tpu.memory_space<vmem>>, vector<16x32xf32>
    tpu.vector_store %arg7[%c0_20, %c0_21], %67 {strides = array<i32>} : memref<16x32xf32, #tpu.memory_space<vmem>>, vector<16x32xf32>,
    return
  }
  func.func @transform_0(%arg0: i32) -> (i32, i32) {
    %c0_i32 = arith.constant 0 : i32
    %c0_i32_0 = arith.constant 0 : i32
    return %arg0, %c0_i32 : i32, i32
  }
  func.func @transform_1(%arg0: i32) -> (i32, i32) {
    %c0_i32 = arith.constant 0 : i32
    %c0_i32_0 = arith.constant 0 : i32
    %c0_i32_1 = arith.constant 0 : i32
    return %c0_i32, %c0_i32_0 : i32, i32
  }
  func.func @transform_2(%arg0: i32) -> (i32, i32) {
    %c0_i32 = arith.constant 0 : i32
    %c0_i32_0 = arith.constant 0 : i32
    %c0_i32_1 = arith.constant 0 : i32
    return %c0_i32, %c0_i32_0 : i32, i32
  }
  func.func @transform_3(%arg0: i32) -> (i32, i32) {
    %c0_i32 = arith.constant 0 : i32
    %c0_i32_0 = arith.constant 0 : i32
    %c0_i32_1 = arith.constant 0 : i32
    return %c0_i32, %c0_i32_0 : i32, i32
  }
  func.func @transform_4(%arg0: i32) -> (i32, i32) {
    %c0_i32 = arith.constant 0 : i32
    %c0_i32_0 = arith.constant 0 : i32
    %c0_i32_1 = arith.constant 0 : i32
    return %c0_i32, %c0_i32_0 : i32, i32
  }
  func.func @transform_5(%arg0: i32) -> (i32, i32) {
    %c0_i32 = arith.constant 0 : i32
    %c0_i32_0 = arith.constant 0 : i32
    %c0_i32_1 = arith.constant 0 : i32
    return %c0_i32, %c0_i32_0 : i32, i32
  }
  func.func @transform_6(%arg0: i32) -> (i32, i32) {
    %c0_i32 = arith.constant 0 : i32
    %c0_i32_0 = arith.constant 0 : i32
    return %arg0, %c0_i32 : i32, i32
  }
}

</mosaic_0001>

<bundles_post_ra>
// kernel: tpu_custom_call.1
= control target key start
LH: loop header
LB: loop body
LE: loop exit
PB: predicated region body
PF: predicated region fallthrough
CT: control target
= control target key end

     0   :  { %vm38_vm0 = vcmask 261120   ;;  %s1533_s0 = inlined_call_operand.vmem [shape: f32[16,32], index: 0, kind: input, shape index: {}]   ;;  %s1534_s1 = inlined_call_operand.vmem [shape: f32[96,32], index: 1, kind: input, shape index: {}]   ;;  %s1535_s2 = inlined_call_operand.vmem [shape: f32[32,32], index: 2, kind: input, shape index: {}]   ;;  %s1536_s3 = inlined_call_operand.vmem [shape: f32[1,32], index: 3, kind: input, shape index: {}]   ;;  %s1537_s4 = inlined_call_operand.vmem [shape: f32[4,32], index: 4, kind: input, shape index: {}]   ;;  %s1538_s5 = inlined_call_operand.vmem [shape: f32[32,4], index: 5, kind: input, shape index: {}]   ;;  %s1539_s6 = inlined_call_operand.hbm [shape: f32[16,32], index: 6, kind: output, shape index: {}]  }
   0x1   :  { %v25_v0 = vld [vmem:[%s1533_s0 + $0x8] sm:$0xff]  ;;  %v24_v1 = vld [vmem:[%s1533_s0] sm:$0xff] }
   0x2   :  { %v26_v2 = vld [vmem:[%s1534_s1] sm:$0xff]  ;;  %1170 = vmatprep.subr.msk.mxu0 %vm38_vm0, %v25_v0 }
   0x3   :  { %1174 = vmatprep.mubr.msk.f32.mxu0 %vm38_vm0, %v26_v2  ;;  %1171 = vmatpush3.xpose.msk.msra.mxu0 %vm38_vm0, %v25_v0 }
   0x4   :  { %1172 = vmatprep.subr.msk.mxu0 %vm38_vm0, %v24_v1 }
   0x5   :  { %11 = vsyncpa [#allocation3], 0  ;;  %v27_v3 = vld [vmem:[%s1534_s1 + $0x8] sm:$0xff]  ;;  %v28_v4 = vld [vmem:[%s1534_s1 + $0x10] sm:$0xff]  ;;  %v1316_v10 = vmov 0.0   ;;  %vm1317_vm1 = vmmov 0  }
   0x6   :  { %v29_v5 = vld [vmem:[%s1534_s1 + $0x18] sm:$0xff]  ;;  %v30_v6 = vld [vmem:[%s1534_s1 + $0x20] sm:$0xff]  ;;  %v31_v7 = vld [vmem:[%s1534_s1 + $0x28] sm:$0xff]  ;;  %1192 = vmatprep.subr.mxu1 %v1316_v10  ;;  %1200 = vmatprep.mubr.msk.f32.mxu1 %vm1317_vm1, %v1316_v10  ;;  %vm530_vm2 = vcmask 31744   ;;  %vm543_vm3 = vcmask 1043456   ;;  %s1318_s15 = smov [#allocation2]  }
   0x7   :  { %1173 = vmatpush3.xpose.msk.msra.mxu0 %vm38_vm0, %v24_v1  ;;  %v32_v8 = vld [vmem:[%s1534_s1 + $0x30] sm:$0xff]  ;;  %v33_v9 = vld [vmem:[%s1534_s1 + $0x38] sm:$0xff]  ;;  %v34_v11 = vld [vmem:[%s1534_s1 + $0x40] sm:$0xff]  ;;  %s1058_s16 = sshll.u32 %s1318_s15, 4  ;;  %s1059_s16 = int_to_ptr.vmem [resolvable:$true] %s1058_s16 }
   0x8   :  { %1225 = vmatprep.subr.mxu0 %v1316_v10  ;;  %v35_v12 = vld [vmem:[%s1534_s1 + $0x48] sm:$0xff]  ;;  %v36_v13 = vld [vmem:[%s1534_s1 + $0x50] sm:$0xff]  ;;  %v37_v14 = vld [vmem:[%s1534_s1 + $0x58] sm:$0xff]  ;;  %s1294_s17 = scalar_lea.vmem %s1059_s16, 256  ;;  %p1299_p1 = scmp.lt.s32.totalorder %s1059_s16, %s1059_s16 }
   0x9   :  { %v206_v28 = vld [vmem:[%s1537_s4] sm:$0xf]  ;;  %p1295_p0 = scmp.ne.s32.totalorder %s1059_s16, %s1294_s17  ;;  %p1300_p2 = scmp.lt.s32.totalorder %s1294_s17, %s1294_s17 }
   0xa   :  { %1175 = vmatmul.mubr.msk.f32.vlgmr.msra.gmra.mxu0 %vm38_vm0, %v27_v3  ;;  %v1448_v40 = vld [vmem:[%s1538_s5] sm:$0xff] }
   0xb   :  { %1177 = vmatprep.mubr.msk.f32.mxu0 %vm38_vm0, %v28_v4  ;;  %p1301_p3 = por %p1300_p2, %p1299_p1 }
   0xd   :  { %p1302_p4 = pnand %p1301_p3, %p1295_p0 }
   0xe   :  { %1178 = vmatmul.mubr.msk.f32.gmra.mxu0 %vm38_vm0, %v29_v5 }
   0xf   :  { %1180 = vmatprep.mubr.msk.f32.mxu0 %vm38_vm0, %v30_v6 }
  0x12   :  { %1181 = vmatmul.mubr.msk.f32.gmra.mxu0 %vm38_vm0, %v31_v7 }
  0x13   :  { %1183 = vmatprep.mubr.msk.f32.mxu0 %vm38_vm0, %v32_v8 }
  0x16   :  { %1184 = vmatmul.mubr.msk.f32.gmra.mxu0 %vm38_vm0, %v33_v9 }
  0x17   :  { %1186 = vmatprep.mubr.msk.f32.mxu0 %vm38_vm0, %v34_v11 }
  0x1a   :  { %1187 = vmatmul.mubr.msk.f32.gmra.mxu0 %vm38_vm0, %v35_v12 }
  0x1b   :  { %1189 = vmatprep.mubr.msk.f32.mxu0 %vm38_vm0, %v36_v13  ;;  %v209_v13 = vld [vmem:[%s1538_s5 + $0x10] sm:$0xff] }
  0x1e   :  { %1190 = vmatmul.mubr.msk.f32.gmra.mxu0 %vm38_vm0, %v37_v14  ;;  %v210_v14 = vld [vmem:[%s1538_s5 + $0x18] sm:$0xff] }
  0x1f   :  { %1233 = vmatprep.mubr.msk.f32.mxu0 %vm1317_vm1, %v1316_v10 }
  0xca   :  { %v1176_v15 = vpop.f32.mrf.mxu0 }
  0xcc   :  { %v147_v16 = vpop.f32.mrf.mxu0 }
  0xce   :  { %v1179_v17 = vpop.f32.mrf.mxu0 }
  0xd0   :  { %v157_v18 = vpop.f32.mrf.mxu0 }
  0xd2   :  { %v1182_v19 = vpop.f32.mrf.mxu0 }
  0xd3   :  { %v291_v30 = vmul.f32 %v1182_v19, %v1179_v17  ;;  %v290_v32 = vmul.f32 %v1182_v19, %v157_v18  ;;  %v289_v33 = vmul.f32 %v1182_v19, %v1176_v15  ;;  %v288_v35 = vmul.f32 %v1182_v19, %v147_v16 }
  0xd4   :  { %v167_v20 = vpop.f32.mrf.mxu0 }
  0xd5   :  { %v214_v21 = vmul.f32 %v1179_v17, %v167_v20  ;;  %v213_v24 = vmul.f32 %v167_v20, %v157_v18  ;;  %v212_v25 = vmul.f32 %v1176_v15, %v167_v20  ;;  %v211_v27 = vmul.f32 %v167_v20, %v147_v16 }
  0xd6   :  { %v1185_v22 = vpop.f32.mrf.mxu0 }
  0xd7   :  { %v439_v23 = vmul.f32 %v1185_v22, %v1179_v17  ;;  %1193 = vmatpush3.msra.mxu1 %v214_v21  ;;  %v438_v26 = vmul.f32 %v1185_v22, %v157_v18  ;;  %v437_v29 = vmul.f32 %v1185_v22, %v1176_v15  ;;  %v436_v31 = vmul.f32 %v1185_v22, %v147_v16 }
  0xd8   :  { %1194 = vmatprep.subr.mxu1 %v1316_v10  ;;  %v177_v34 = vpop.f32.mrf.mxu0 }
  0xd9   :  { %1195 = vmatpush3.msra.mxu1 %v213_v24  ;;  %1226 = vmatpush3.msra.mxu0 %v439_v23  ;;  %v365_v36 = vmul.f32 %v1179_v17, %v177_v34  ;;  %v364_v37 = vmul.f32 %v177_v34, %v157_v18  ;;  %v363_v38 = vmul.f32 %v1176_v15, %v177_v34  ;;  %v962_v15 = vld [vmem:[%s1535_s2 + $0x18] sm:$0xff] }
  0xda   :  { %1196 = vmatprep.subr.mxu1 %v1316_v10  ;;  %1227 = vmatprep.subr.mxu0 %v1316_v10  ;;  %v362_v39 = vmul.f32 %v177_v34, %v147_v16  ;;  %v1454_v41 = vpop.f32.mrf.mxu0  ;;  %v961_v16 = vld [vmem:[%s1535_s2 + $0x10] sm:$0xff] }
  0xdb   :  { %1197 = vmatpush3.msra.mxu1 %v212_v25  ;;  %1228 = vmatpush3.msra.mxu0 %v438_v26 }
  0xdc   :  { %1198 = vmatprep.subr.mxu1 %v1316_v10  ;;  %1229 = vmatprep.subr.mxu0 %v1316_v10  ;;  %v1456_v42 = vpop.f32.mrf.mxu0 }
  0xdd   :  { %1199 = vmatpush3.msra.mxu1 %v211_v27  ;;  %1230 = vmatpush3.msra.mxu0 %v437_v29 }
  0xde   :  { %1201 = vmatmul.mubr.msk.f32.vlgmr.msra.gmra.mxu1 %vm38_vm0, %v206_v28  ;;  %1203 = vmatprep.subr.mxu1 %v1316_v10  ;;  %v1458_v43 = vpop.f32.mrf.mxu0 }
  0xdf   :  { %1231 = vmatprep.subr.mxu0 %v1316_v10  ;;  %1204 = vmatpush3.msra.mxu1 %v291_v30 }
  0xe0   :  { %1232 = vmatpush3.msra.mxu0 %v436_v31  ;;  %1205 = vmatprep.subr.mxu1 %v1316_v10  ;;  %v1460_v45 = vpop.f32.mrf.mxu0 }
  0xe1   :  { %1211 = vmatprep.mubr.msk.f32.mxu1 %vm1317_vm1, %v1316_v10  ;;  %1206 = vmatpush3.msra.mxu1 %v290_v32 }
  0xe2   :  { %1234 = vmatmul.mubr.msk.f32.vlgmr.msra.gmra.mxu0 %vm38_vm0, %v206_v28  ;;  %1207 = vmatprep.subr.mxu1 %v1316_v10 }
  0xe3   :  { %1208 = vmatpush3.msra.mxu1 %v289_v33  ;;  %1246 = vmatprep.mubr.msk.f32.mxu0 %vm530_vm2, %v1448_v40 }
  0xe4   :  { %1209 = vmatprep.subr.mxu1 %v1316_v10 }
  0xe5   :  { %1210 = vmatpush3.msra.mxu1 %v288_v35 }
  0xe6   :  { %1212 = vmatmul.mubr.msk.f32.vlgmr.msra.gmra.mxu1 %vm38_vm0, %v206_v28  ;;  %1214 = vmatprep.subr.mxu1 %v1316_v10 }
  0xe7   :  { %1215 = vmatpush3.msra.mxu1 %v365_v36  ;;  %1222 = vmatprep.mubr.msk.f32.mxu1 %vm1317_vm1, %v1316_v10 }
  0xe8   :  { %1216 = vmatprep.subr.mxu1 %v1316_v10 }
  0xe9   :  { %1217 = vmatpush3.msra.mxu1 %v364_v37 }
  0xea   :  { %1218 = vmatprep.subr.mxu1 %v1316_v10 }
  0xeb   :  { %1219 = vmatpush3.msra.mxu1 %v363_v38 }
  0xec   :  { %1220 = vmatprep.subr.mxu1 %v1316_v10  ;;  %v208_v10 = vld [vmem:[%s1538_s5 + $0x8] sm:$0xff] }
  0xed   :  { %1221 = vmatpush3.msra.mxu1 %v362_v39 }
  0xee   :  { %1223 = vmatmul.mubr.msk.f32.vlgmr.msra.gmra.mxu1 %vm38_vm0, %v206_v28 }
  0xef   :  { %1238 = vmatprep.mubr.msk.f32.mxu1 %vm530_vm2, %v1448_v40 }
 0x19e   :  { %v284_v44 = vpop.f32.mrf.mxu1 }
 0x1a0   :  { %v1202_v46 = vpop.f32.mrf.mxu1 }
 0x1a1   :  { %v960_v46 = vld [vmem:[%s1535_s2 + $0x8] sm:$0xff] }
 0x1a2   :  { %v506_v47 = vpop.f32.mrf.mxu0 }
 0x1a4   :  { %v1235_v48 = vpop.f32.mrf.mxu0 }
 0x1a6   :  { %v358_v49 = vpop.f32.mrf.mxu1 }
 0x1a7   :  { %v510_v51 = vmax.f32 %v284_v44, %v358_v49 }
 0x1a8   :  { %v1213_v50 = vpop.f32.mrf.mxu1 }
 0x1ae   :  { %v432_v52 = vpop.f32.mrf.mxu1 }
 0x1af   :  { %v511_v53 = vmax.f32 %v510_v51, %v432_v52 }
 0x1b0   :  { %v1224_v54 = vpop.f32.mrf.mxu1 }
 0x1b1   :  { %v512_v55 = vmax.f32 %v511_v53, %v506_v47 }
 0x1b3   :  { %v513_v56 = vsub.f32 %v284_v44, %v512_v55  ;;  %v516_v57 = vsub.f32 %v358_v49, %v512_v55  ;;  %v519_v58 = vsub.f32 %v432_v52, %v512_v55  ;;  %v522_v59 = vsub.f32 %v506_v47, %v512_v55  ;;  %v959_v47 = vld [vmem:[%s1535_s2] sm:$0xff] }
 0x1b5   :  { %v514_v60 = vmul.f32 1.442695, %v513_v56  ;;  %v517_v61 = vmul.f32 1.442695, %v516_v57  ;;  %v520_v62 = vmul.f32 1.442695, %v519_v58 }
 0x1b6   :  { %v523_v63 = vmul.f32 1.442695, %v522_v59 }
 0x1b7   :  { %1284 = vpow2.f32 %v514_v60 }
 0x1b8   :  { %1286 = vpow2.f32 %v517_v61 }
 0x1b9   :  { %1288 = vpow2.f32 %v520_v62 }
 0x1ba   :  { %1290 = vpow2.f32 %v523_v63 }
 0x1c4   :  { %v1285_v0 = vpop.eup %1284 }
 0x1c5   :  { %v1287_v1 = vpop.eup %1286 }
 0x1c6   :  { %v525_v2 = vadd.f32 %v1287_v1, %v1285_v0  ;;  %v1289_v3 = vpop.eup %1288 }
 0x1c7   :  { %v1291_v5 = vpop.eup %1290 }
 0x1c8   :  { %v526_v4 = vadd.f32 %v1289_v3, %v525_v2 }
 0x1ca   :  { %v527_v6 = vadd.f32 %v1291_v5, %v526_v4 }
 0x1cc   :  { %1292 = vrcp.f32 %v527_v6 }
 0x1d9   :  { %v1293_v7 = vpop.eup %1292 }
 0x1da   :  { %v529_v8 = vmul.f32 %v1293_v7, %v1285_v0  ;;  %v636_v9 = vmul.f32 %v1293_v7, %v1287_v1  ;;  %v733_v11 = vmul.f32 %v1293_v7, %v1289_v3  ;;  %v830_v12 = vmul.f32 %v1293_v7, %v1291_v5 }
 0x1dc   :  { %1236 = vmatprep.subr.msk.mxu1 %vm543_vm3, %v529_v8  ;;  %1244 = vmatprep.subr.msk.mxu0 %vm543_vm3, %v636_v9 }
 0x1dd   :  { %1237 = vmatpush3.msk.msra.mxu1 %vm543_vm3, %v529_v8  ;;  %1245 = vmatpush3.msk.msra.mxu0 %vm543_vm3, %v636_v9 }
 0x1de   :  { %1239 = vmatmul.mubr.msk.f32.vlgmr.msra.gmra.mxu1 %vm530_vm2, %v208_v10  ;;  %1247 = vmatmul.mubr.msk.f32.vlgmr.msra.gmra.mxu0 %vm530_vm2, %v208_v10 }
 0x1df   :  { %1252 = vmatprep.subr.msk.mxu1 %vm543_vm3, %v733_v11  ;;  %1260 = vmatprep.subr.msk.mxu0 %vm543_vm3, %v830_v12 }
 0x1e0   :  { %1253 = vmatpush3.msk.msra.mxu1 %vm543_vm3, %v733_v11  ;;  %1261 = vmatpush3.msk.msra.mxu0 %vm543_vm3, %v830_v12 }
 0x1e1   :  { %1241 = vmatprep.mubr.msk.f32.mxu1 %vm530_vm2, %v209_v13  ;;  %1249 = vmatprep.mubr.msk.f32.mxu0 %vm530_vm2, %v209_v13 }
 0x1e2   :  { %1242 = vmatmul.mubr.msk.f32.gmra.mxu1 %vm530_vm2, %v210_v14  ;;  %1250 = vmatmul.mubr.msk.f32.gmra.mxu0 %vm530_vm2, %v210_v14 }
 0x1e3   :  { %1254 = vmatprep.mubr.msk.f32.mxu1 %vm530_vm2, %v1448_v40  ;;  %1262 = vmatprep.mubr.msk.f32.mxu0 %vm530_vm2, %v1448_v40 }
 0x1e4   :  { %1268 = vmatprep.subr.mxu1 %v962_v15 }
 0x1e6   :  { %1255 = vmatmul.mubr.msk.f32.vlgmr.msra.gmra.mxu1 %vm530_vm2, %v208_v10  ;;  %1263 = vmatmul.mubr.msk.f32.vlgmr.msra.gmra.mxu0 %vm530_vm2, %v208_v10 }
 0x1e7   :  { %1257 = vmatprep.mubr.msk.f32.mxu1 %vm530_vm2, %v209_v13  ;;  %1265 = vmatprep.mubr.msk.f32.mxu0 %vm530_vm2, %v209_v13 }
 0x1e8   :  { %1269 = vmatpush3.msra.mxu1 %v962_v15 }
 0x1e9   :  { %1270 = vmatprep.subr.mxu1 %v961_v16 }
 0x1ea   :  { %1258 = vmatmul.mubr.msk.f32.gmra.mxu1 %vm530_vm2, %v210_v14  ;;  %1266 = vmatmul.mubr.msk.f32.gmra.mxu0 %vm530_vm2, %v210_v14 }
 0x1eb   :  { %1271 = vmatpush3.msra.mxu1 %v961_v16 }
 0x1ec   :  { %1272 = vmatprep.subr.mxu1 %v960_v46 }
 0x1ed   :  { %1273 = vmatpush3.msra.mxu1 %v960_v46 }
 0x1ee   :  { %1274 = vmatprep.subr.mxu1 %v959_v47 }
 0x1ef   :  { %1275 = vmatpush3.msra.mxu1 %v959_v47 }
 0x29e   :  { %v1240_v17 = vpop.f32.mrf.mxu1  ;;  %v1248_v18 = vpop.f32.mrf.mxu0 }
 0x29f   :  { %v633_v27 = vmul.f32 %v1240_v17, %v1456_v42  ;;  %v726_v28 = vmul.f32 %v1248_v18, %v1454_v41 }
 0x2a0   :  { %v613_v19 = vpop.f32.mrf.mxu1  ;;  %v706_v20 = vpop.f32.mrf.mxu0 }
 0x2a1   :  { %v632_v25 = vmul.f32 %v613_v19, %v1456_v42  ;;  %v725_v26 = vmul.f32 %v1454_v41, %v706_v20  ;;  %v730_v36 = vadd.f32 %v726_v28, %v633_v27 }
 0x2a2   :  { %v1243_v21 = vpop.f32.mrf.mxu1  ;;  %v1251_v22 = vpop.f32.mrf.mxu0 }
 0x2a3   :  { %v729_v33 = vadd.f32 %v725_v26, %v632_v25  ;;  %v635_v53 = vmul.f32 %v1243_v21, %v1456_v42  ;;  %v728_v54 = vmul.f32 %v1251_v22, %v1454_v41 }
 0x2a4   :  { %v623_v23 = vpop.f32.mrf.mxu1  ;;  %v716_v24 = vpop.f32.mrf.mxu0 }
 0x2a5   :  { %v634_v38 = vmul.f32 %v623_v23, %v1456_v42  ;;  %v727_v39 = vmul.f32 %v1454_v41, %v716_v24  ;;  %v732_v61 = vadd.f32 %v728_v54, %v635_v53 }
 0x2a6   :  { %v1256_v29 = vpop.f32.mrf.mxu1  ;;  %v1264_v30 = vpop.f32.mrf.mxu0 }
 0x2a7   :  { %v823_v34 = vmul.f32 %v1256_v29, %v1460_v45  ;;  %v731_v55 = vadd.f32 %v727_v39, %v634_v38  ;;  %v920_v56 = vmul.f32 %v1264_v30, %v1458_v43 }
 0x2a8   :  { %v803_v31 = vpop.f32.mrf.mxu1  ;;  %v900_v32 = vpop.f32.mrf.mxu0 }
 0x2a9   :  { %v822_v35 = vmul.f32 %v803_v31, %v1460_v45  ;;  %v919_v40 = vmul.f32 %v1458_v43, %v900_v32  ;;  %v827_v50 = vadd.f32 %v823_v34, %v730_v36 }
 0x2aa   :  { %v1259_v37 = vpop.f32.mrf.mxu1  ;;  %v1267_v48 = vpop.f32.mrf.mxu0 }
 0x2ab   :  { %v826_v44 = vadd.f32 %v822_v35, %v729_v33  ;;  %v825_v58 = vmul.f32 %v1259_v37, %v1460_v45  ;;  %v924_v60 = vadd.f32 %v920_v56, %v827_v50  ;;  %v922_v42 = vmul.f32 %v1267_v48, %v1458_v43 }
 0x2ac   :  { %v813_v49 = vpop.f32.mrf.mxu1  ;;  %v910_v57 = vpop.f32.mrf.mxu0 }
 0x2ad   :  { %v824_v51 = vmul.f32 %v813_v49, %v1460_v45  ;;  %v923_v52 = vadd.f32 %v919_v40, %v826_v44  ;;  %v921_v62 = vmul.f32 %v1458_v43, %v910_v57  ;;  %v829_v63 = vadd.f32 %v825_v58, %v732_v61  ;;  %v1107_v45 = vld [vmem:[%s1536_s3] ss:$0 sm:$0xff] }
 0x2af   :  { %927 = vxpose.xlu0.b32.start [1/4] (short) (narrow) %v923_v52, 16  ;;  %v828_v59 = vadd.f32 %v824_v51, %v731_v55  ;;  %v926_v41 = vadd.f32 %v922_v42, %v829_v63 }
 0x2b1   :  { %v925_v0 = vadd.f32 %v921_v62, %v828_v59 }
 0x2b3   :  { %928 = vxpose.xlu0.b32.cont [2/4] (short) (narrow) %v924_v60, 16 }
 0x2b7   :  { %929 = vxpose.xlu0.b32.cont [3/4] (short) (narrow) %v925_v0, 16 }
 0x2bb   :  { %930 = vxpose.xlu0.b32.end [4/4] (short) (narrow) %v926_v41, 16 }
 0x32b   :  { %v943_v1 = vpop.trf.xlu0 }
 0x32c   :  { %1276 = vmatprep.mubr.msk.f32.mxu1 %vm38_vm0, %v943_v1 }
 0x32f   :  { %v944_v2 = vpop.trf.xlu0 }
 0x330   :  { %1277 = vmatmul.mubr.msk.f32.vlgmr.msra.gmra.mxu1 %vm38_vm0, %v944_v2 }
 0x3f0   :  { %v1278_v3 = vpop.f32.mrf.mxu1 }
 0x3f1   :  { %v1048_v4 = vadd.f32 %v1278_v3, %v1107_v45 }
 0x3f2   :  { %v1042_v5 = vpop.f32.mrf.mxu1 }
 0x3f3   :  { %1052 = vst.msk [vmem:[#allocation2 + $0x8] sm:$0xff] %vm38_vm0, %v1048_v4  ;;  %v1043_v43 = vadd.f32 %v1107_v45, %v1042_v5 }
 0x3f5   :  { %1051 = vst.msk [vmem:[#allocation2] sm:$0xff] %vm38_vm0, %v1043_v43 }
 0x3f6   :  { %1305 = shalt.err (!%p1302_p4)
}
 0x3f7   :  { %s1319_s18 = smov 128   ;;  %s1320_s3 = smov 8  }
 0x3f8   :  { %1064 = dma.vmem_to_hbm [thread:$0]  %s1059_s16, 256, %s1539_s6, [#allocation3], %s1319_s18, %s1319_s18, %s1320_s3  }
 0x3f9   :  { %1314 = dma.done.wait [#allocation3], 256  }
 0x3fa   :  { %1315 = vsyncadd [#allocation3], 4294967040 }
 0x3fb   :  { %1068 = vsyncpa [#allocation3], 1 }

</bundles_post_ra>
